<compile_context>
chip_gen: v5e
topology: v5e:2x2
jax: 0.10.0
libtpu: 0.0.40
codegen_flags: <defaults>
</compile_context>

<pallas_src>
import jax
import jax.numpy as jnp
from jax import lax
from jax.experimental import pallas as pl
from jax.experimental.pallas import tpu as pltpu


def _round_up(x, m):
    return ((x + m - 1) // m) * m


def _dist2pos_kernel(scale_ref, x_ref, w_ref, o_ref, acc_ref):
    # x_ref: [tB, tD]   w_ref: [tK, tD] (PyTorch layout, D on lanes for both)
    # o_ref: [tB, tK]   acc_ref: VMEM f32 [tB, tK]
    k = pl.program_id(2)

    @pl.when(k == 0)
    def _():
        acc_ref[...] = jnp.zeros_like(acc_ref)

    # y_tile += x_tile @ w_tile.T  (contract the shared feature axis D).
    acc_ref[...] += lax.dot_general(
        x_ref[...],
        w_ref[...],
        dimension_numbers=(((1,), (1,)), ((), ())),
        preferred_element_type=jnp.float32,
    )

    @pl.when(k == pl.num_programs(2) - 1)
    def _():
        # Fused `scaling` module: multiply by the scalar at finalize.
        o_ref[...] = (acc_ref[...] * scale_ref[0]).astype(o_ref.dtype)


def dist2pos_forward(x, weight, scale, *, tb_max=256, tk_max=256, td_max=512):
    """y = (x.float() @ weight.T) * scale, matching Dist2Pos.forward.

    x:      [batch, node_num]            (any float dtype; cast to f32)
    weight: [embed_dim, node_num] f32    (PyTorch nn.Linear layout, no bias)
    scale:  scalar f32
    returns [batch, embed_dim] f32
    """
    x = x.astype(jnp.float32)
    weight = weight.astype(jnp.float32)
    B, D = x.shape
    K, D2 = weight.shape
    assert D == D2, "dim_feature mismatch"

    # Tile sizes: sublane-aligned on B, lane-dense (128-multiples) on K and D,
    # capped so the double-buffered working set stays far under the scoped
    # VMEM limit on every generation (v5e/v6e/v7x).
    tB = min(_round_up(B, 8), tb_max)
    tK = min(_round_up(K, 128), tk_max)
    tD = min(_round_up(D, 128), td_max)

    Bp = _round_up(B, tB)
    Kp = _round_up(K, tK)
    Dp = _round_up(D, tD)

    # Zero-pad so the grid divides exactly. Zeros are inert in the contraction
    # and padded output rows/cols are sliced off below; padding K also makes
    # the output store lane-dense (>=128 wide).
    if (Bp, Dp) != (B, D):
        x = jnp.pad(x, ((0, Bp - B), (0, Dp - D)))
    if (Kp, Dp) != (K, D):
        weight = jnp.pad(weight, ((0, Kp - K), (0, Dp - D)))

    scale_arr = jnp.asarray(scale, jnp.float32).reshape((1,))

    grid = (Bp // tB, Kp // tK, Dp // tD)

    out_padded = pl.pallas_call(
        _dist2pos_kernel,
        out_shape=jax.ShapeDtypeStruct((Bp, Kp), jnp.float32),
        grid=grid,
        in_specs=[
            pl.BlockSpec(memory_space=pltpu.MemorySpace.SMEM),   # scale scalar
            pl.BlockSpec((tB, tD), lambda i, j, k: (i, k)),      # x  [B, D]
            pl.BlockSpec((tK, tD), lambda i, j, k: (j, k)),      # W  [K, D]
        ],
        out_specs=pl.BlockSpec((tB, tK), lambda i, j, k: (i, j)),
        scratch_shapes=[pltpu.VMEM((tB, tK), jnp.float32)],
        compiler_params=pltpu.CompilerParams(
            dimension_semantics=("parallel", "parallel", "arbitrary"),
        ),
        cost_estimate=pl.CostEstimate(
            flops=2 * B * K * D,
            transcendentals=0,
            bytes_accessed=4 * (B * D + K * D + B * K),
        ),
    )(scale_arr, x, weight)

    return out_padded[:B, :K]


def _xavier_uniform(key, shape, dtype=jnp.float32):
    # Matches torch.nn.init.xavier_uniform_ for a 2-D weight (fan_out, fan_in).
    fan_out, fan_in = shape
    limit = (6.0 / (fan_in + fan_out)) ** 0.5
    return jax.random.uniform(key, shape, dtype, minval=-limit, maxval=limit)


if __name__ == "__main__":
    # Small shapes consistent with Dist2Pos: node_num=32 (dim_feature),
    # embed_dim=16 (num_k), batch=8.
    node_num = 32
    embed_dim = 16
    batch = 8

    key = jax.random.PRNGKey(0)
    k_w, k_x = jax.random.split(key)

    # embedding.__init__ "random weights" branch: xavier_uniform on
    # a (num_k, dim_feature) = (embed_dim, node_num) parameter.
    weight = _xavier_uniform(k_w, (embed_dim, node_num))
    # scaling module's scalar parameter.
    scale = jnp.float32(0.5)
    x = jax.random.normal(k_x, (batch, node_num), dtype=jnp.float32)

    y = dist2pos_forward(x, weight, scale)
    y = jax.block_until_ready(y)

    # Correctness check against the plain JAX reference of the module forward.
    y_ref = (x @ weight.T) * scale
    assert y.shape == (batch, embed_dim)
    assert jnp.allclose(y, y_ref, atol=1e-5, rtol=1e-5)

    print("KERNEL_OK")
</pallas_src>

<mosaic_0001>
module attributes {stable_mosaic.version = 11 : i64} {
  func.func @_dist2pos_kernel(%arg0: i32, %arg1: i32, %arg2: i32, %arg3: memref<1xf32, #tpu.memory_space<smem>>, %arg4: memref<8x128xf32, #tpu.memory_space<vmem>>, %arg5: memref<128x128xf32, #tpu.memory_space<vmem>>, %arg6: memref<8x128xf32, #tpu.memory_space<vmem>>, %arg7: memref<8x128xf32, #tpu.memory_space<vmem>>) attributes {dimension_semantics = [#tpu.dimension_semantics<parallel>, #tpu.dimension_semantics<parallel>, #tpu.dimension_semantics<arbitrary>], iteration_bounds = array<i64: 1, 1, 1>, scalar_prefetch = 0 : i64, scratch_operands = 1 : i64, tpu.core_type = #tpu.core_type<tc>, window_params = [{transform_indices = @transform_0, window_bounds = array<i64: 1>}, {transform_indices = @transform_1, window_bounds = array<i64: 8, 128>}, {transform_indices = @transform_2, window_bounds = array<i64: 128, 128>}, {transform_indices = @transform_3, window_bounds = array<i64: 8, 128>}]} {
    %c0_i32 = arith.constant 0 : i32
    %0 = arith.cmpi eq, %arg2, %c0_i32 : i32
    %1 = arith.extui %0 : i1 to i32
    %c0_i32_0 = arith.constant 0 : i32
    %2 = arith.cmpi ne, %1, %c0_i32_0 : i32
    scf.if %2 {
      %cst_10 = arith.constant 0.000000e+00 : f32
      %12 = vector.broadcast %cst_10 : f32 to vector<8x128xf32>
      %c0_11 = arith.constant 0 : index
      %c0_12 = arith.constant 0 : index
      %13 = vector.load %arg7[%c0_11, %c0_12] : memref<8x128xf32, #tpu.memory_space<vmem>>, vector<8x128xf32>
      tpu.vector_store %arg7[%c0_11, %c0_12], %12 {strides = array<i32>} : memref<8x128xf32, #tpu.memory_space<vmem>>, vector<8x128xf32>,
    } else {
    }
    %c0 = arith.constant 0 : index
    %c0_1 = arith.constant 0 : index
    %3 = vector.load %arg7[%c0, %c0_1] : memref<8x128xf32, #tpu.memory_space<vmem>>, vector<8x128xf32>
    %c0_2 = arith.constant 0 : index
    %c0_3 = arith.constant 0 : index
    %4 = vector.load %arg4[%c0_2, %c0_3] : memref<8x128xf32, #tpu.memory_space<vmem>>, vector<8x128xf32>
    %c0_4 = arith.constant 0 : index
    %c0_5 = arith.constant 0 : index
    %5 = vector.load %arg5[%c0_4, %c0_5] : memref<128x128xf32, #tpu.memory_space<vmem>>, vector<128x128xf32>
    %cst = arith.constant dense<0.000000e+00> : vector<8x128xf32>
    %6 = tpu.matmul %4, %5, %cst {dimension_numbers = #tpu.dot_dimension_numbers<[1], [1], [0], [0], [0, 0, 1, 0], [], []>} : vector<8x128xf32>, vector<128x128xf32>, vector<8x128xf32> -> vector<8x128xf32>
    %7 = arith.addf %3, %6 : vector<8x128xf32>
    %c0_6 = arith.constant 0 : index
    %c0_7 = arith.constant 0 : index
    %8 = vector.load %arg7[%c0_6, %c0_7] : memref<8x128xf32, #tpu.memory_space<vmem>>, vector<8x128xf32>
    tpu.vector_store %arg7[%c0_6, %c0_7], %7 {strides = array<i32>} : memref<8x128xf32, #tpu.memory_space<vmem>>, vector<8x128xf32>,
    %c0_i32_8 = arith.constant 0 : i32
    %9 = arith.cmpi eq, %arg2, %c0_i32_8 : i32
    %10 = arith.extui %9 : i1 to i32
    %c0_i32_9 = arith.constant 0 : i32
    %11 = arith.cmpi ne, %10, %c0_i32_9 : i32
    scf.if %11 {
      %c0_10 = arith.constant 0 : index
      %c0_11 = arith.constant 0 : index
      %12 = vector.load %arg7[%c0_10, %c0_11] : memref<8x128xf32, #tpu.memory_space<vmem>>, vector<8x128xf32>
      %c0_12 = arith.constant 0 : index
      %13 = memref.load %arg3[%c0_12] : memref<1xf32, #tpu.memory_space<smem>>
      %14 = vector.broadcast %13 : f32 to vector<8x128xf32>
      %15 = arith.mulf %12, %14 : vector<8x128xf32>
      %c0_13 = arith.constant 0 : index
      %c0_14 = arith.constant 0 : index
      %16 = vector.load %arg6[%c0_13, %c0_14] : memref<8x128xf32, #tpu.memory_space<vmem>>, vector<8x128xf32>
      tpu.vector_store %arg6[%c0_13, %c0_14], %15 {strides = array<i32>} : memref<8x128xf32, #tpu.memory_space<vmem>>, vector<8x128xf32>,
    } else {
    }
    return
  }
  func.func @transform_0(%arg0: i32, %arg1: i32, %arg2: i32) -> i32 {
    %c0_i32 = arith.constant 0 : i32
    %c0_i32_0 = arith.constant 0 : i32
    return %c0_i32 : i32
  }
  func.func @transform_1(%arg0: i32, %arg1: i32, %arg2: i32) -> (i32, i32) {
    %c0_i32 = arith.constant 0 : i32
    return %arg0, %arg2 : i32, i32
  }
  func.func @transform_2(%arg0: i32, %arg1: i32, %arg2: i32) -> (i32, i32) {
    %c0_i32 = arith.constant 0 : i32
    return %arg1, %arg2 : i32, i32
  }
  func.func @transform_3(%arg0: i32, %arg1: i32, %arg2: i32) -> (i32, i32) {
    %c0_i32 = arith.constant 0 : i32
    return %arg0, %arg1 : i32, i32
  }
}

</mosaic_0001>

<bundles_post_ra>
// kernel: tpu_custom_call.1
= control target key start
LH: loop header
LB: loop body
LE: loop exit
PB: predicated region body
PF: predicated region fallthrough
CT: control target
= control target key end

     0   :  { %9 = vsyncpa [#allocation5], 0  ;;  %s237_s0 = inlined_call_operand.<no memory space> [shape: f32[1], index: 0, kind: input, shape index: {}]   ;;  %s238_s1 = inlined_call_operand.hbm [shape: f32[8,128], index: 1, kind: input, shape index: {}]   ;;  %s239_s2 = inlined_call_operand.hbm [shape: f32[128,128], index: 2, kind: input, shape index: {}]   ;;  %s240_s3 = inlined_call_operand.hbm [shape: f32[8,128], index: 3, kind: output, shape index: {}]  }
   0x1   :  { %10 = vsyncpa [#allocation8], 0 }
   0x2   :  { %11 = vsyncpa [#allocation6], 0  ;;  %s19_s14 = sshll.u32 %s238_s1, 4  ;;  %s200_s15 = smov [#allocation4]   ;;  %s20_s14 = int_to_ptr.hbm [resolvable:$true] %s19_s14 }
   0x3   :  { %s21_s16 = sshll.u32 %s200_s15, 4  ;;  %s29_s19 = sshll.u32 %s239_s2, 4  ;;  %s22_s16 = int_to_ptr.vmem [resolvable:$true] %s21_s16  ;;  %s30_s19 = int_to_ptr.hbm [resolvable:$true] %s29_s19 }
   0x4   :  { %24 = dma.hbm_to_vmem [thread:$0]  %s20_s14, 128, %s22_s16, [#allocation5]  }
   0x5   :  { %s201_s20 = smov [#allocation7]   ;;  %s202_s22 = smov 128  }
   0x6   :  { %s31_s21 = sshll.u32 %s201_s20, 4  ;;  %s203_s23 = smov 8   ;;  %s32_s21 = int_to_ptr.vmem [resolvable:$true] %s31_s21 }
   0x7   :  { %37 = dma.hbm_to_vmem [thread:$0]  %s30_s19, 2048, %s32_s21, [#allocation8], %s202_s22, %s202_s22, %s203_s23  }
   0x8   :  { %194 = dma.done.wait [#allocation5], 128  }
   0x9   :  { %195 = vsyncadd [#allocation5], 4294967168 }
   0xa   :  { %196 = dma.done.wait [#allocation8], 2048  }
   0xb   :  { %197 = vsyncadd [#allocation8], 4294965248  ;;  %v68_v0 = vld [vmem:[#allocation7 + $0x78] sm:$0xff]  ;;  %v67_v1 = vld [vmem:[#allocation7 + $0x70] sm:$0xff]  ;;  %v96_v17 = vstv %s237_s0  ;;  %s204_s24 = smov [#allocation9]   ;;  %s106_s28 = sshll.u32 %s240_s3, 4  ;;  %s107_s28 = int_to_ptr.hbm [resolvable:$true] %s106_s28 }
   0xc   :  { %69 = vmatpush.xpose.msra.mxu0 %v68_v0  ;;  %v66_v2 = vld [vmem:[#allocation7 + $0x68] sm:$0xff]  ;;  %v65_v3 = vld [vmem:[#allocation7 + $0x60] sm:$0xff]  ;;  %v64_v4 = vld [vmem:[#allocation7 + $0x58] sm:$0xff]  ;;  %s104_s25 = sshll.u32 %s204_s24, 4  ;;  %s105_s25 = int_to_ptr.vmem [resolvable:$true] %s104_s25 }
   0xd   :  { %v63_v5 = vld [vmem:[#allocation7 + $0x50] sm:$0xff]  ;;  %v62_v6 = vld [vmem:[#allocation7 + $0x48] sm:$0xff]  ;;  %v61_v7 = vld [vmem:[#allocation7 + $0x40] sm:$0xff] }
   0xe   :  { %v60_v8 = vld [vmem:[#allocation7 + $0x38] sm:$0xff]  ;;  %v59_v9 = vld [vmem:[#allocation7 + $0x30] sm:$0xff]  ;;  %v58_v10 = vld [vmem:[#allocation7 + $0x28] sm:$0xff] }
   0xf   :  { %v57_v11 = vld [vmem:[#allocation7 + $0x20] sm:$0xff]  ;;  %v56_v12 = vld [vmem:[#allocation7 + $0x18] sm:$0xff]  ;;  %v55_v13 = vld [vmem:[#allocation7 + $0x10] sm:$0xff] }
  0x10   :  { %70 = vmatpush.xpose.msra.mxu0 %v67_v1  ;;  %v54_v14 = vld [vmem:[#allocation7 + $0x8] sm:$0xff]  ;;  %v53_v15 = vld [vmem:[#allocation7] sm:$0xff]  ;;  %v52_v16 = vld [vmem:[#allocation4] sm:$0xff] }
  0x14   :  { %71 = vmatpush.xpose.msra.mxu0 %v66_v2 }
  0x18   :  { %72 = vmatpush.xpose.msra.mxu0 %v65_v3 }
  0x1c   :  { %73 = vmatpush.xpose.msra.mxu0 %v64_v4 }
  0x20   :  { %74 = vmatpush.xpose.msra.mxu0 %v63_v5 }
  0x24   :  { %75 = vmatpush.xpose.msra.mxu0 %v62_v6 }
  0x28   :  { %76 = vmatpush.xpose.msra.mxu0 %v61_v7 }
  0x2c   :  { %77 = vmatpush.xpose.msra.mxu0 %v60_v8 }
  0x30   :  { %78 = vmatpush.xpose.msra.mxu0 %v59_v9 }
  0x34   :  { %79 = vmatpush.xpose.msra.mxu0 %v58_v10 }
  0x38   :  { %80 = vmatpush.xpose.msra.mxu0 %v57_v11 }
  0x3c   :  { %81 = vmatpush.xpose.msra.mxu0 %v56_v12 }
  0x40   :  { %82 = vmatpush.xpose.msra.mxu0 %v55_v13 }
  0x44   :  { %83 = vmatpush.xpose.msra.mxu0 %v54_v14 }
  0x48   :  { %84 = vmatpush.xpose.msra.mxu0 %v53_v15 }
  0x4b   :  { %85 = vmatmul.f32.vlgmr.msra.gmra.mxu0 %v52_v16 }
  0xc8   :  { %v86_v18 = vpop.f32.mrf.mxu0 }
  0xc9   :  { %v97_v19 = vmul.f32 %v96_v17, %v86_v18 }
  0xcb   :  { %98 = vst [vmem:[#allocation9] sm:$0xff] %v97_v19 }
  0xcc   :  { %109 = dma.vmem_to_hbm [thread:$0]  %s105_s25, 128, %s107_s28, [#allocation6]  }
  0xcd   :  { %198 = dma.done.wait [#allocation6], 128  }
  0xce   :  { %199 = vsyncadd [#allocation6], 4294967168 }
  0xcf   :  { %114 = vsyncpa [#allocation5], 1 }
  0xd0   :  { %115 = vsyncpa [#allocation8], 1 }
  0xd1   :  { %116 = vsyncpa [#allocation6], 1 }

</bundles_post_ra>
